<compile_context>
chip_gen: v7x
topology: tpu7x:2x2x1
jax: 0.10.0
libtpu: 0.0.40
codegen_flags: <defaults>
</compile_context>

<pallas_src>
import functools

import jax
import jax.numpy as jnp
from jax import lax
from jax.experimental import pallas as pl
from jax.experimental.pallas import tpu as pltpu


def _static_int_pow(x, p):
    """x**p for static positive int p via repeated squaring (VPU multiplies only)."""
    result = None
    base = x
    while p:
        if p & 1:
            result = base if result is None else result * base
        p >>= 1
        if p:
            base = base * base
    return result


def _kd_loss_kernel(
    preds_ref,      # (TN, C) in VMEM, native dtype
    labels_ref,     # (TN, 1) int32 in VMEM
    teacher_ref,    # (TN, C) in VMEM, native dtype
    out_ref,        # (1, 1) f32 in SMEM (this core's partial sum)
    acc_ref,        # (TN, 1) f32 VMEM scratch (fused, pre-weighted per-row accumulator)
    *,
    alpha,
    temperature,
    n_true,
    n_classes,
    tile_n,
    tiles_per_core,
):
    j = pl.program_id(1)  # row-tile index within this core ("arbitrary" reduction axis)

    @pl.when(j == 0)
    def _init():
        acc_ref[...] = jnp.zeros_like(acc_ref)

    # Logical (unclamped) global row-tile index. The index_map clamps it for the DMA;
    # the valid mask below zeroes any rows past the true batch size, so duplicated or
    # partial tiles contribute exactly 0.
    g = pl.program_id(0) * tiles_per_core + j

    preds = preds_ref[...].astype(jnp.float32)      # (TN, C)
    teacher = teacher_ref[...].astype(jnp.float32)  # (TN, C)
    labels = labels_ref[...]                        # (TN, 1) int32
    tn, c = preds.shape

    T = float(temperature)
    inv_T = 1.0 / T

    # Valid-row mask. Partial/duplicate tiles hold unspecified data in the tail rows,
    # so we must select with jnp.where (NOT multiply) to avoid NaN/Inf poisoning.
    row_ids = lax.broadcasted_iota(jnp.int32, (tn, 1), 0) + g * tile_n
    valid = row_ids < n_true                        # (TN, 1) bool

    # ---- temperature-scaled student stats (shared by CE and KL) ----
    ps = preds * inv_T                              # constant-reciprocal multiply
    mp = jnp.max(ps, axis=-1, keepdims=True)
    et_p = jnp.exp(ps - mp)                         # EUP pass #1
    sum_et_p = jnp.sum(et_p, axis=-1, keepdims=True)
    log_sum_et_p = jnp.log(sum_et_p)

    # ---- cross-entropy: ce_row = lse(preds) - preds[label] ----
    reuse_exp = (T > 0.0) and (T == int(T)) and (1 <= int(T) <= 32)
    if reuse_exp:
        # exp(preds - T*mp) == et_p ** T  (T positive int -> VPU multiplies, no extra exp)
        exp_shift = _static_int_pow(et_p, int(T))
    else:
        # T*mp == max(preds) for T > 0, so reuse the existing max (no second max pass).
        exp_shift = jnp.exp(preds - T * mp)
    lse = T * mp + jnp.log(jnp.sum(exp_shift, axis=-1, keepdims=True))

    class_ids = lax.broadcasted_iota(jnp.int32, (tn, c), 1)
    gathered = jnp.sum(
        jnp.where(class_ids == labels, preds, 0.0), axis=-1, keepdims=True
    )                                               # preds[label], no f32 one-hot
    ce_row = lse - gathered                         # (TN, 1)

    # ---- KL(softmax(teacher/T) || softmax(preds/T)) per row, algebraically simplified:
    #   sum_c p_t*(log_pt - log_q) = sum(et*(ts-ps))/sum_et + (mp-mt) + log(sum_et_p) - log(sum_et)
    ts = teacher * inv_T
    mt = jnp.max(ts, axis=-1, keepdims=True)
    et = jnp.exp(ts - mt)                           # EUP pass #2
    sum_et = jnp.sum(et, axis=-1, keepdims=True)
    cross = jnp.sum(et * (ts - ps), axis=-1, keepdims=True)
    kl_row = cross / sum_et + (mp - mt) + log_sum_et_p - jnp.log(sum_et)  # (TN, 1)

    # ---- fused, pre-weighted accumulation (single (TN,1) scratch) ----
    ce_w = (1.0 - alpha) / float(n_true)
    kl_w = (alpha * T * T) / float(n_true * n_classes)
    contrib = ce_row * ce_w + kl_row * kl_w
    acc_ref[...] += jnp.where(valid, contrib, 0.0)

    @pl.when(j == pl.num_programs(1) - 1)
    def _finalize():
        out_ref[0, 0] = jnp.sum(acc_ref[...])


def distillation_loss(
    preds, target, teacher_outputs, *, alpha, temperature, tile_n=None, num_cores=2
):
    """preds: (N, C) float, target: (N,) int, teacher_outputs: (N, C) float -> scalar f32."""
    n, c = preds.shape

    # ---- tile sizing: account for 128-lane padding and in-kernel f32 temporaries ----
    itemsize = max(
        jnp.dtype(preds.dtype).itemsize, jnp.dtype(teacher_outputs.dtype).itemsize
    )
    c_lanes = -(-c // 128) * 128  # VMEM tiles are lane-padded to 128
    if tile_n is None:
        budget_bytes = 12 * 1024 * 1024  # leaves headroom under the 32 MiB limit below
        per_row = 2 * 2 * c_lanes * itemsize + 6 * c_lanes * 4  # inputs x2 bufs + temps
        tile_n = max(8, min(2048, budget_bytes // max(per_row, 1)))
    n8 = -(-n // 8) * 8
    tile_n = max(8, min((int(tile_n) // 8) * 8, n8))

    num_row_tiles = -(-n // tile_n)
    num_cores = max(1, min(int(num_cores), num_row_tiles))
    tiles_per_core = -(-num_row_tiles // num_cores)

    # Only the labels get reshaped (tiny); preds/teacher go to the kernel untouched
    # (no jnp.pad -> no extra HBM copies of the big tensors).
    labels2d = target.astype(jnp.int32).reshape(n, 1)

    def row_idx(ci, j):
        g = ci * tiles_per_core + j
        # Clamp for the DMA; rows past N are masked out inside the kernel.
        return (jnp.minimum(g, num_row_tiles - 1), 0)

    kernel = functools.partial(
        _kd_loss_kernel,
        alpha=float(alpha),
        temperature=float(temperature),
        n_true=int(n),
        n_classes=int(c),
        tile_n=int(tile_n),
        tiles_per_core=int(tiles_per_core),
    )

    cost = pl.CostEstimate(
        flops=14 * n * c,
        transcendentals=2 * n * c,
        bytes_accessed=preds.size * jnp.dtype(preds.dtype).itemsize
        + teacher_outputs.size * jnp.dtype(teacher_outputs.dtype).itemsize
        + n * 4
        + num_cores * 4,
    )

    partial = pl.pallas_call(
        kernel,
        out_shape=jax.ShapeDtypeStruct((num_cores, 1), jnp.float32),
        grid_spec=pltpu.PrefetchScalarGridSpec(
            num_scalar_prefetch=0,
            grid=(num_cores, tiles_per_core),
            in_specs=[
                pl.BlockSpec((tile_n, c), row_idx),  # preds tile
                pl.BlockSpec((tile_n, 1), row_idx),  # labels tile
                pl.BlockSpec((tile_n, c), row_idx),  # teacher tile
            ],
            out_specs=pl.BlockSpec(
                (1, 1), lambda ci, j: (ci, 0), memory_space=pltpu.SMEM
            ),
            scratch_shapes=[
                pltpu.VMEM((tile_n, 1), jnp.float32),  # fused per-row partial sums
            ],
        ),
        compiler_params=pltpu.CompilerParams(
            dimension_semantics=("parallel", "arbitrary"),  # 2-TC split x reduction
            vmem_limit_bytes=32 * 1024 * 1024,
        ),
        cost_estimate=cost,
    )(preds, labels2d, teacher_outputs)

    # Combine the per-core partials (tiny) outside the kernel.
    return jnp.sum(partial)


def _reference(preds, target, teacher_outputs, *, alpha, temperature):
    preds = preds.astype(jnp.float32)
    teacher = teacher_outputs.astype(jnp.float32)
    n, c = preds.shape
    log_probs = jax.nn.log_softmax(preds, axis=-1)
    ce = -jnp.mean(jnp.take_along_axis(log_probs, target[:, None], axis=-1))
    log_q = jax.nn.log_softmax(preds / temperature, axis=-1)
    p_t = jax.nn.softmax(teacher / temperature, axis=-1)
    kl = jnp.sum(p_t * (jnp.log(p_t) - log_q)) / (n * c)
    return kl * (alpha * temperature * temperature) + ce * (1.0 - alpha)


if __name__ == "__main__":
    key = jax.random.PRNGKey(0)
    k1, k2, k3 = jax.random.split(key, 3)

    alpha, temperature = 0.5, 4.0

    # Primary case: N multiple of 8, integer temperature (exp-reuse path).
    N, C = 8, 32
    preds = jax.random.normal(k1, (N, C), dtype=jnp.float32)
    teacher_outputs = jax.random.normal(k2, (N, C), dtype=jnp.float32)
    target = jax.random.randint(k3, (N,), 0, C, dtype=jnp.int32)

    out = distillation_loss(
        preds, target, teacher_outputs, alpha=alpha, temperature=temperature
    )
    out = jax.block_until_ready(out)
    ref = _reference(preds, target, teacher_outputs, alpha=alpha, temperature=temperature)
    assert jnp.allclose(out, ref, atol=1e-5, rtol=1e-5), (out, ref)

    # Ragged case: N not a multiple of 8 -> partial last block + valid mask (no padding).
    N2 = 6
    preds2 = preds[:N2]
    teacher2 = teacher_outputs[:N2]
    target2 = target[:N2]
    out2 = distillation_loss(
        preds2, target2, teacher2, alpha=alpha, temperature=temperature
    )
    out2 = jax.block_until_ready(out2)
    ref2 = _reference(preds2, target2, teacher2, alpha=alpha, temperature=temperature)
    assert jnp.allclose(out2, ref2, atol=1e-5, rtol=1e-5), (out2, ref2)

    # Multi-tile + 2-core split + non-integer temperature + ragged tail:
    # N=37, tile_n=8 -> 5 row tiles over a (2, 3) grid (one clamped duplicate tile).
    k4, k5, k6 = jax.random.split(jax.random.PRNGKey(1), 3)
    N3, T3 = 37, 2.5
    preds3 = jax.random.normal(k4, (N3, C), dtype=jnp.float32)
    teacher3 = jax.random.normal(k5, (N3, C), dtype=jnp.float32)
    target3 = jax.random.randint(k6, (N3,), 0, C, dtype=jnp.int32)
    out3 = distillation_loss(
        preds3, target3, teacher3, alpha=alpha, temperature=T3, tile_n=8
    )
    out3 = jax.block_until_ready(out3)
    ref3 = _reference(preds3, target3, teacher3, alpha=alpha, temperature=T3)
    assert jnp.allclose(out3, ref3, atol=1e-5, rtol=1e-5), (out3, ref3)

    print("KERNEL_OK")
</pallas_src>

<mosaic_0001>
module attributes {stable_mosaic.version = 11 : i64} {
  func.func @_kd_loss_kernel(%arg0: i32, %arg1: i32, %arg2: memref<8x32xf32, #tpu.memory_space<vmem>>, %arg3: memref<8x1xi32, #tpu.memory_space<vmem>>, %arg4: memref<8x32xf32, #tpu.memory_space<vmem>>, %arg5: memref<1x1xf32, #tpu.memory_space<smem>>, %arg6: memref<8x1xf32, #tpu.memory_space<vmem>>) attributes {dimension_semantics = [#tpu.dimension_semantics<parallel>, #tpu.dimension_semantics<arbitrary>], iteration_bounds = array<i64: 1, 1>, scalar_prefetch = 0 : i64, scratch_operands = 1 : i64, tpu.core_type = #tpu.core_type<tc>, window_params = [{transform_indices = @transform_0, window_bounds = array<i64: 8, 32>}, {transform_indices = @transform_1, window_bounds = array<i64: 8, 1>}, {transform_indices = @transform_2, window_bounds = array<i64: 8, 32>}, {transform_indices = @transform_3, window_bounds = array<i64: 1, 1>}]} {
    %c0_i32 = arith.constant 0 : i32
    %0 = arith.cmpi eq, %arg1, %c0_i32 : i32
    %1 = arith.extui %0 : i1 to i32
    %c0_i32_0 = arith.constant 0 : i32
    %2 = arith.cmpi ne, %1, %c0_i32_0 : i32
    scf.if %2 {
      %cst_26 = arith.constant 0.000000e+00 : f32
      %72 = vector.broadcast %cst_26 : f32 to vector<8x1xf32>
      %c0_27 = arith.constant 0 : index
      %c0_28 = arith.constant 0 : index
      %73 = vector.load %arg6[%c0_27, %c0_28] : memref<8x1xf32, #tpu.memory_space<vmem>>, vector<8x1xf32>
      tpu.vector_store %arg6[%c0_27, %c0_28], %72 {strides = array<i32>} : memref<8x1xf32, #tpu.memory_space<vmem>>, vector<8x1xf32>,
    } else {
    }
    %c1_i32 = arith.constant 1 : i32
    %3 = arith.muli %arg0, %c1_i32 : i32
    %4 = arith.addi %3, %arg1 : i32
    %c0 = arith.constant 0 : index
    %c0_1 = arith.constant 0 : index
    %5 = vector.load %arg2[%c0, %c0_1] : memref<8x32xf32, #tpu.memory_space<vmem>>, vector<8x32xf32>
    %c0_2 = arith.constant 0 : index
    %c0_3 = arith.constant 0 : index
    %6 = vector.load %arg4[%c0_2, %c0_3] : memref<8x32xf32, #tpu.memory_space<vmem>>, vector<8x32xf32>
    %c0_4 = arith.constant 0 : index
    %c0_5 = arith.constant 0 : index
    %7 = vector.load %arg3[%c0_4, %c0_5] : memref<8x1xi32, #tpu.memory_space<vmem>>, vector<8x1xi32>
    %8 = tpu.iota {dimensions = array<i32: 0>} : vector<8x1xi32>
    %c8_i32 = arith.constant 8 : i32
    %9 = arith.muli %4, %c8_i32 : i32
    %10 = vector.broadcast %9 : i32 to vector<8x1xi32>
    %11 = arith.addi %8, %10 : vector<8x1xi32>
    %c8_i32_6 = arith.constant 8 : i32
    %12 = vector.broadcast %c8_i32_6 : i32 to vector<8x1xi32>
    %13 = arith.cmpi slt, %11, %12 : vector<8x1xi32>
    %cst = arith.constant 2.500000e-01 : f32
    %14 = vector.broadcast %cst : f32 to vector<8x32xf32>
    %15 = arith.mulf %5, %14 : vector<8x32xf32>
    %cst_7 = arith.constant dense<0xFF800000> : vector<8xf32>
    %16 = vector.multi_reduction <maximumf>, %15, %cst_7 [1] : vector<8x32xf32> to vector<8xf32>
    %17 = vector.shape_cast %16 : vector<8xf32> to vector<8x1xf32>
    %18 = vector.broadcast %17 : vector<8x1xf32> to vector<8x32xf32>
    %19 = arith.subf %15, %18 : vector<8x32xf32>
    %20 = math.exp %19 : vector<8x32xf32>
    %cst_8 = arith.constant dense<0.000000e+00> : vector<8xf32>
    %21 = vector.multi_reduction <add>, %20, %cst_8 [1] : vector<8x32xf32> to vector<8xf32>
    %22 = vector.shape_cast %21 : vector<8xf32> to vector<8x1xf32>
    %23 = math.log %22 : vector<8x1xf32>
    %24 = arith.mulf %20, %20 : vector<8x32xf32>
    %25 = arith.mulf %24, %24 : vector<8x32xf32>
    %cst_9 = arith.constant 4.000000e+00 : f32
    %26 = vector.broadcast %cst_9 : f32 to vector<8x1xf32>
    %27 = arith.mulf %26, %17 : vector<8x1xf32>
    %cst_10 = arith.constant dense<0.000000e+00> : vector<8xf32>
    %28 = vector.multi_reduction <add>, %25, %cst_10 [1] : vector<8x32xf32> to vector<8xf32>
    %29 = vector.shape_cast %28 : vector<8xf32> to vector<8x1xf32>
    %30 = math.log %29 : vector<8x1xf32>
    %31 = arith.addf %27, %30 : vector<8x1xf32>
    %32 = tpu.iota {dimensions = array<i32: 1>} : vector<8x32xi32>
    %33 = vector.broadcast %7 : vector<8x1xi32> to vector<8x32xi32>
    %34 = arith.cmpi eq, %32, %33 : vector<8x32xi32>
    %cst_11 = arith.constant 0.000000e+00 : f32
    %35 = vector.broadcast %cst_11 : f32 to vector<8x32xf32>
    %36 = arith.select %34, %5, %35 : vector<8x32xi1>, vector<8x32xf32>
    %cst_12 = arith.constant dense<0.000000e+00> : vector<8xf32>
    %37 = vector.multi_reduction <add>, %36, %cst_12 [1] : vector<8x32xf32> to vector<8xf32>
    %38 = vector.shape_cast %37 : vector<8xf32> to vector<8x1xf32>
    %39 = arith.subf %31, %38 : vector<8x1xf32>
    %cst_13 = arith.constant 2.500000e-01 : f32
    %40 = vector.broadcast %cst_13 : f32 to vector<8x32xf32>
    %41 = arith.mulf %6, %40 : vector<8x32xf32>
    %cst_14 = arith.constant dense<0xFF800000> : vector<8xf32>
    %42 = vector.multi_reduction <maximumf>, %41, %cst_14 [1] : vector<8x32xf32> to vector<8xf32>
    %43 = vector.shape_cast %42 : vector<8xf32> to vector<8x1xf32>
    %44 = vector.broadcast %43 : vector<8x1xf32> to vector<8x32xf32>
    %45 = arith.subf %41, %44 : vector<8x32xf32>
    %46 = math.exp %45 : vector<8x32xf32>
    %cst_15 = arith.constant dense<0.000000e+00> : vector<8xf32>
    %47 = vector.multi_reduction <add>, %46, %cst_15 [1] : vector<8x32xf32> to vector<8xf32>
    %48 = vector.shape_cast %47 : vector<8xf32> to vector<8x1xf32>
    %49 = arith.subf %41, %15 : vector<8x32xf32>
    %50 = arith.mulf %46, %49 : vector<8x32xf32>
    %cst_16 = arith.constant dense<0.000000e+00> : vector<8xf32>
    %51 = vector.multi_reduction <add>, %50, %cst_16 [1] : vector<8x32xf32> to vector<8xf32>
    %52 = vector.shape_cast %51 : vector<8xf32> to vector<8x1xf32>
    %53 = arith.divf %52, %48 : vector<8x1xf32>
    %54 = arith.subf %17, %43 : vector<8x1xf32>
    %55 = arith.addf %53, %54 : vector<8x1xf32>
    %56 = arith.addf %55, %23 : vector<8x1xf32>
    %57 = math.log %48 : vector<8x1xf32>
    %58 = arith.subf %56, %57 : vector<8x1xf32>
    %cst_17 = arith.constant 6.250000e-02 : f32
    %59 = vector.broadcast %cst_17 : f32 to vector<8x1xf32>
    %60 = arith.mulf %39, %59 : vector<8x1xf32>
    %cst_18 = arith.constant 3.125000e-02 : f32
    %61 = vector.broadcast %cst_18 : f32 to vector<8x1xf32>
    %62 = arith.mulf %58, %61 : vector<8x1xf32>
    %63 = arith.addf %60, %62 : vector<8x1xf32>
    %c0_19 = arith.constant 0 : index
    %c0_20 = arith.constant 0 : index
    %64 = vector.load %arg6[%c0_19, %c0_20] : memref<8x1xf32, #tpu.memory_space<vmem>>, vector<8x1xf32>
    %cst_21 = arith.constant 0.000000e+00 : f32
    %65 = vector.broadcast %cst_21 : f32 to vector<8x1xf32>
    %66 = arith.select %13, %63, %65 : vector<8x1xi1>, vector<8x1xf32>
    %67 = arith.addf %64, %66 : vector<8x1xf32>
    %c0_22 = arith.constant 0 : index
    %c0_23 = arith.constant 0 : index
    %68 = vector.load %arg6[%c0_22, %c0_23] : memref<8x1xf32, #tpu.memory_space<vmem>>, vector<8x1xf32>
    tpu.vector_store %arg6[%c0_22, %c0_23], %67 {strides = array<i32>} : memref<8x1xf32, #tpu.memory_space<vmem>>, vector<8x1xf32>,
    %c0_i32_24 = arith.constant 0 : i32
    %69 = arith.cmpi eq, %arg1, %c0_i32_24 : i32
    %70 = arith.extui %69 : i1 to i32
    %c0_i32_25 = arith.constant 0 : i32
    %71 = arith.cmpi ne, %70, %c0_i32_25 : i32
    scf.if %71 {
      %c0_26 = arith.constant 0 : index
      %c0_27 = arith.constant 0 : index
      %72 = vector.load %arg6[%c0_26, %c0_27] : memref<8x1xf32, #tpu.memory_space<vmem>>, vector<8x1xf32>
      %73 = vector.shape_cast %72 : vector<8x1xf32> to vector<1x8x1xf32>
      %cst_28 = arith.constant dense<0.000000e+00> : vector<1xf32>
      %74 = vector.multi_reduction <add>, %73, %cst_28 [1, 2] : vector<1x8x1xf32> to vector<1xf32>
      %75 = vector.shape_cast %74 : vector<1xf32> to vector<1x1x1xf32>
      %76 = vector.extract %75[0, 0, 0] : f32 from vector<1x1x1xf32>
      %c0_29 = arith.constant 0 : index
      %c0_30 = arith.constant 0 : index
      %77 = memref.load %arg5[%c0_29, %c0_30] : memref<1x1xf32, #tpu.memory_space<smem>>
      memref.store %76, %arg5[%c0_29, %c0_30] : memref<1x1xf32, #tpu.memory_space<smem>>
    } else {
    }
    return
  }
  func.func @transform_0(%arg0: i32, %arg1: i32) -> (i32, i32) {
    %c1_i32 = arith.constant 1 : i32
    %0 = arith.muli %arg0, %c1_i32 : i32
    %1 = arith.addi %0, %arg1 : i32
    %c0_i32 = arith.constant 0 : i32
    %2 = arith.minsi %1, %c0_i32 : i32
    %c0_i32_0 = arith.constant 0 : i32
    %c0_i32_1 = arith.constant 0 : i32
    return %2, %c0_i32_0 : i32, i32
  }
  func.func @transform_1(%arg0: i32, %arg1: i32) -> (i32, i32) {
    %c1_i32 = arith.constant 1 : i32
    %0 = arith.muli %arg0, %c1_i32 : i32
    %1 = arith.addi %0, %arg1 : i32
    %c0_i32 = arith.constant 0 : i32
    %2 = arith.minsi %1, %c0_i32 : i32
    %c0_i32_0 = arith.constant 0 : i32
    %c0_i32_1 = arith.constant 0 : i32
    return %2, %c0_i32_0 : i32, i32
  }
  func.func @transform_2(%arg0: i32, %arg1: i32) -> (i32, i32) {
    %c1_i32 = arith.constant 1 : i32
    %0 = arith.muli %arg0, %c1_i32 : i32
    %1 = arith.addi %0, %arg1 : i32
    %c0_i32 = arith.constant 0 : i32
    %2 = arith.minsi %1, %c0_i32 : i32
    %c0_i32_0 = arith.constant 0 : i32
    %c0_i32_1 = arith.constant 0 : i32
    return %2, %c0_i32_0 : i32, i32
  }
  func.func @transform_3(%arg0: i32, %arg1: i32) -> (i32, i32) {
    %c0_i32 = arith.constant 0 : i32
    %c0_i32_0 = arith.constant 0 : i32
    return %arg0, %c0_i32 : i32, i32
  }
}

</mosaic_0001>

<bundles_post_ra>
// kernel: tpu_custom_call.1
= control target key start
LH: loop header
LB: loop body
LE: loop exit
PB: predicated region body
PF: predicated region fallthrough
CT: control target
= control target key end

     0   :  { %vm113_vm0 = vcmask 261120   ;;  %v254_v5 = vmov 0   ;;  %s308_s0 = inlined_call_operand.vmem [shape: f32[8,32], index: 0, kind: input, shape index: {}]   ;;  %s309_s1 = inlined_call_operand.vmem [shape: s32[8,1], index: 1, kind: input, shape index: {}]   ;;  %s310_s2 = inlined_call_operand.vmem [shape: f32[8,32], index: 2, kind: input, shape index: {}]   ;;  %s311_s3 = inlined_call_operand.hbm [shape: f32[1,1], index: 3, kind: output, shape index: {}]  }
   0x1   :  { %v103_v0 = vld [vmem:[%s308_s0] sm:$0xff]  ;;  %228 = vset.pattern.permute.xlu1 %v254_v5  ;;  %229 = vset.pattern.permute.xlu0 %v254_v5 }
   0x2   :  { %v104_v1 = vld [vmem:[%s310_s2] sm:$0xff]  ;;  %v112_v3 = vmul.f32 0.25, %v103_v0 }
   0x3   :  { %v105_v2 = vld [vmem:[%s309_s1] sm:$0xff]  ;;  %v145_v4 = vmul.f32 0.25, %v104_v1 }
   0x4   :  { %8 = vsyncpa [#allocation4], 0  ;;  %137 = vperm.xlu1 %228, %v105_v2   ;;  %v114_v6 = vsel %vm113_vm0, %v112_v3, -inf  ;;  %v134_v14 = vlaneseq  ;;  %vm100_vm2 = vcmask 7168   ;;  %v255_v29 = vmov 0.0   ;;  %s242_s18 = scalar_lea.hbm %s311_s3, 16 }
   0x5   :  { %115 = vmax.xlane.f32.xlu0 %v114_v6  ;;  %v146_v7 = vsel %vm113_vm0, %v145_v4, -inf  ;;  %v155_v18 = vsub.f32 %v145_v4, %v112_v3  ;;  %101 = vst.msk [vmem:[#allocation2] sm:$0xff] %vm100_vm2, %v255_v29  ;;  %p243_p0 = scmp.ne.s32.totalorder %s311_s3, %s242_s18  ;;  %p246_p1 = scmp.lt.u32.totalorder %s242_s18, %s311_s3 }
   0x6   :  { %v135_v19 = vand.u32 127, %v134_v14 }
   0x7   :  { %p248_p2 = pnand %p246_p1, %p243_p0 }
   0x9   :  { %147 = vmax.xlane.f32.xlu0 %v146_v7 }
   0xc   :  { %v171_v52 = vld [vmem:[#allocation2] sm:$0xff] }
  0x83   :  { %v138_v20 = vpop.permute.xlu1 %137 }
  0x84   :  { %vm139_vm1 = vcmp.eq.s32.totalorder %v135_v19, %v138_v20 }
  0x85   :  { %v140_v26 = vsel %vm139_vm1, %v103_v0, 0.0 }
  0x86   :  { %v141_v28 = vsel %vm113_vm0, %v140_v26, 0.0 }
  0x92   :  { %v116_v8 = vpop.xlane.xlu0 %115 }
  0x93   :  { %v117_v9 = vsub.f32 %v112_v3, %v116_v8  ;;  %v127_v40 = vmul.f32 4.0, %v116_v8 }
  0x95   :  { %v118_v10 = vmul.f32 1.442695, %v117_v9 }
  0x96   :  { %v148_v11 = vpop.xlane.xlu0 %147 }
  0x97   :  { %230 = vpow2.f32 %v118_v10  ;;  %v149_v12 = vsub.f32 %v145_v4, %v148_v11  ;;  %v162_v37 = vsub.f32 %v116_v8, %v148_v11 }
  0x99   :  { %v150_v13 = vmul.f32 1.442695, %v149_v12 }
  0x9b   :  { %232 = vpow2.f32 %v150_v13 }
  0xa1   :  { %v231_v15 = vpop.eup %230 }
  0xa2   :  { %v120_v16 = vsel %vm113_vm0, %v231_v15, 0.0  ;;  %v125_v17 = vmul.f32 %v231_v15, %v231_v15 }
  0xa3   :  { %121 = vadd.xlane.f32.xlu0 %v120_v16 }
  0xa4   :  { %v126_v21 = vmul.f32 %v125_v17, %v125_v17 }
  0xa5   :  { %v233_v22 = vpop.eup %232 }
  0xa6   :  { %v128_v23 = vsel %vm113_vm0, %v126_v21, 0.0  ;;  %v152_v24 = vsel %vm113_vm0, %v233_v22, 0.0  ;;  %v156_v25 = vmul.f32 %v233_v22, %v155_v18 }
  0xa7   :  { %129 = vadd.xlane.f32.xlu0 %v128_v23  ;;  %153 = vadd.xlane.f32.xlu1 %v152_v24 }
  0xa8   :  { %v157_v27 = vsel %vm113_vm0, %v156_v25, 0.0 }
  0xab   :  { %158 = vadd.xlane.f32.xlu0 %v157_v27 }
  0xaf   :  { %142 = vadd.xlane.f32.xlu0 %v141_v28 }
 0x130   :  { %v122_v30 = vpop.xlane.xlu0 %121 }
 0x131   :  { %234 = vlog2.f32 %v122_v30 }
 0x134   :  { %v154_v31 = vpop.xlane.xlu1 %153  ;;  %v130_v32 = vpop.xlane.xlu0 %129 }
 0x135   :  { %236 = vrcp.f32 %v154_v31 }
 0x136   :  { %238 = vlog2.f32 %v154_v31 }
 0x137   :  { %240 = vlog2.f32 %v130_v32 }
 0x138   :  { %v159_v35 = vpop.xlane.xlu0 %158 }
 0x13b   :  { %v235_v33 = vpop.eup %234 }
 0x13c   :  { %v124_v41 = vmul.f32 0.6931472, %v235_v33  ;;  %v143_v44 = vpop.xlane.xlu0 %142 }
 0x13f   :  { %v237_v34 = vpop.eup %236 }
 0x140   :  { %v239_v36 = vpop.eup %238  ;;  %v161_v38 = vmul.f32 %v237_v34, %v159_v35 }
 0x141   :  { %v241_v39 = vpop.eup %240  ;;  %v166_v45 = vmul.f32 0.6931472, %v239_v36 }
 0x142   :  { %v132_v42 = vmul.f32 0.6931472, %v241_v39  ;;  %v163_v43 = vadd.f32 %v162_v37, %v161_v38 }
 0x144   :  { %v164_v46 = vadd.f32 %v163_v43, %v124_v41  ;;  %v133_v47 = vadd.f32 %v132_v42, %v127_v40 }
 0x146   :  { %v167_v48 = vsub.f32 %v164_v46, %v166_v45  ;;  %v144_v49 = vsub.f32 %v133_v47, %v143_v44 }
 0x148   :  { %v169_v50 = vmul.f32 0.03125, %v167_v48  ;;  %v168_v51 = vmul.f32 0.0625, %v144_v49 }
 0x14a   :  { %v170_v53 = vadd.f32 %v169_v50, %v168_v51 }
 0x14c   :  { %v173_v54 = vadd.f32 %v171_v52, %v170_v53 }
 0x14e   :  { %175 = vst.msk [vmem:[#allocation2] sm:$0xff] %vm100_vm2, %v173_v54 }
 0x155   :  { %v179_v55 = vld [vmem:[#allocation2] sm:$0xff] }
 0x156   :  { %v180_v56 = vsel %vm100_vm2, %v179_v55, 0.0 }
 0x157   :  { %181 = vadd.xlane.f32.xlu0 %v180_v56 }
 0x1e4   :  { %v182_v57 = vpop.xlane.xlu0 %181 }
 0x1e5   :  { %v183_v58 = vrot.slane %v182_v57, 4 }
 0x1e7   :  { %v184_v59 = vadd.f32 %v183_v58, %v182_v57 }
 0x1e9   :  { %v185_v60 = vrot.slane %v184_v59, 2 }
 0x1eb   :  { %v186_v61 = vadd.f32 %v185_v60, %v184_v59 }
 0x1ed   :  { %v187_v62 = vrot.slane %v186_v61, 1 }
 0x1ef   :  { %v188_v63 = vadd.f32 %v187_v62, %v186_v61 }
 0x1f1   :  { %223 = vpush %v188_v63 }
 0x222   :  { %s224_s0 = spop %223 }
 0x223   :  { %191 = sst [smem:[#allocation3]] %s224_s0 }
 0x224   :  { %251 = shalt.err (!%p248_p2)
}
 0x225   :  { %s256_s23 = smov [#allocation3]  }
 0x226   :  { %199 = dma.smem_to_hbm %s256_s23, 16, %s311_s3, [#allocation4]  }
 0x227   :  { %252 = dma.done.wait [#allocation4], 16  }
 0x228   :  { %253 = vsyncadd [#allocation4], 4294967280 }
 0x229   :  { %203 = sfence }
 0x22a   :  { %204 = vsyncpa [#allocation4], 1 }

</bundles_post_ra>
